<compile_context>
chip_gen: v5e
topology: v5e:2x2
jax: 0.10.0
libtpu: 0.0.40
codegen_flags: <defaults>
</compile_context>

<pallas_src>
import math

import jax
import jax.numpy as jnp
from jax import lax
from jax.experimental import pallas as pl
from jax.experimental.pallas import tpu as pltpu


# ---------------------------------------------------------------------------
# Fused Pallas kernel: qkv = x@Wqkv+b ; per-head softmax(QK^T)@V ; y@Wproj+b
# ---------------------------------------------------------------------------

def _make_fused_mha_kernel(num_heads: int, head_dim: int, inv_scale: float):
    emb = num_heads * head_dim

    def kernel(x_ref, wqkv_ref, bqkv_ref, wproj_ref, bproj_ref, o_ref):
        # x_ref block: (1, n, e) -- one batch element, fully resident in VMEM.
        x = x_ref[0]                                                  # (n, e)

        # ---- fused QKV projection (weights pre-permuted to [Q | K | V]) ----
        qkv = (jnp.dot(x, wqkv_ref[...], preferred_element_type=jnp.float32)
               + bqkv_ref[...])                                       # (n, 3e)

        # Static slices -- no einops transpose needed.
        # Fold the 1/sqrt(emb) attention scale into Q (O(n*d) instead of O(n^2)).
        q_all = qkv[:, :emb] * inv_scale
        k_all = qkv[:, emb:2 * emb]
        v_all = qkv[:, 2 * emb:]

        # ---- per-head attention, unrolled (num_heads is small & static) ----
        head_outs = []
        for h in range(num_heads):
            sl = slice(h * head_dim, (h + 1) * head_dim)
            q = q_all[:, sl]                                          # (n, d)
            k = k_all[:, sl]                                          # (n, d)
            v = v_all[:, sl]                                          # (n, d)

            # QK^T without materializing k.T: contract the shared d axis.
            energy = lax.dot_general(
                q, k, (((1,), (1,)), ((), ())),
                preferred_element_type=jnp.float32)                   # (n, n)

            # Numerically-stable softmax over keys; approx reciprocal runs on
            # the otherwise-idle EUP slot.
            m = jnp.max(energy, axis=-1, keepdims=True)
            p = jnp.exp(energy - m)
            denom = jnp.sum(p, axis=-1, keepdims=True)
            att = p * pl.reciprocal(denom, approx=True)
            # TODO(synk): boolean attention mask and dropout > 0 not implemented
            #             (module defaults: mask=None, dropout=0 -> identity).

            head_outs.append(
                jnp.dot(att, v, preferred_element_type=jnp.float32))  # (n, d)

        # 'b h n d -> b n (h d)' is just a head-major concat on the lane axis.
        y = jnp.concatenate(head_outs, axis=-1)                       # (n, e)

        # ---- output projection, lane-dense (n, e) store ----
        out = (jnp.dot(y, wproj_ref[...], preferred_element_type=jnp.float32)
               + bproj_ref[...])
        o_ref[0] = out.astype(o_ref.dtype)

    return kernel


def fused_mha(x, w_qkv_perm, b_qkv_perm, w_proj, b_proj, *, num_heads: int):
    """x: (b, n, e) -> (b, n, e), single fused kernel, grid over batch only."""
    b, n, e = x.shape
    d = e // num_heads
    inv_scale = 1.0 / (float(e) ** 0.5)   # NOTE: spec scales by sqrt(emb_size)

    kernel = _make_fused_mha_kernel(num_heads, d, inv_scale)

    def _full(shape):
        # Whole-array block, same block for every grid step (stays resident).
        return pl.BlockSpec(shape, lambda i: (0,) * len(shape))

    return pl.pallas_call(
        kernel,
        out_shape=jax.ShapeDtypeStruct((b, n, e), x.dtype),
        grid=(b,),
        in_specs=[
            pl.BlockSpec((1, n, e), lambda i: (i, 0, 0)),   # x, per-batch block
            _full((e, 3 * e)),                              # Wqkv (permuted)
            _full((1, 3 * e)),                              # bqkv (permuted)
            _full((e, e)),                                  # Wproj
            _full((1, e)),                                  # bproj
        ],
        out_specs=pl.BlockSpec((1, n, e), lambda i: (i, 0, 0)),
        compiler_params=pltpu.CompilerParams(
            dimension_semantics=("parallel",)),             # shards on v7x 2-TC
    )(x, w_qkv_perm, b_qkv_perm, w_proj, b_proj)


# ---------------------------------------------------------------------------
# Module wrapper
# ---------------------------------------------------------------------------

class MultiHeadAttentionPallas:
    def __init__(self, emb_size: int = 32, num_heads: int = 4, dropout: float = 0.0,
                 key=jax.random.PRNGKey(0)):
        assert emb_size % num_heads == 0
        self.emb_size = emb_size
        self.num_heads = num_heads
        d = emb_size // num_heads
        # dropout p == 0 -> identity (att_drop is a no-op)
        # TODO(synk): dropout > 0 not implemented (module default is 0).

        k1, k2, k3, k4 = jax.random.split(key, 4)
        scale = 1.0 / math.sqrt(emb_size)
        # Canonical weights (as the PyTorch module would hold them), stored
        # (in_features, out_features) so y = x @ W + b.  The fused-QKV columns
        # follow the einops '(h d qkv)' interpretation.
        self.w_qkv = jax.random.uniform(k1, (emb_size, 3 * emb_size),
                                        jnp.float32, -scale, scale)
        self.b_qkv = jax.random.uniform(k2, (3 * emb_size,),
                                        jnp.float32, -scale, scale)
        self.w_proj = jax.random.uniform(k3, (emb_size, emb_size),
                                         jnp.float32, -scale, scale)
        self.b_proj = jax.random.uniform(k4, (emb_size,),
                                         jnp.float32, -scale, scale)

        # Pre-permute the fused-QKV columns once at init: '(h d qkv)' -> '(qkv h d)'
        # so the kernel sees [Q | K | V] contiguous blocks (no HBM transpose).
        wp = self.w_qkv.reshape(emb_size, num_heads, d, 3)
        self.w_qkv_perm = jnp.transpose(wp, (0, 3, 1, 2)).reshape(emb_size,
                                                                  3 * emb_size)
        bp = self.b_qkv.reshape(num_heads, d, 3)
        self.b_qkv_perm = jnp.transpose(bp, (2, 0, 1)).reshape(1, 3 * emb_size)
        self.b_proj2d = self.b_proj.reshape(1, emb_size)

    def __call__(self, x, mask=None):
        # x: (b, n, emb)
        # TODO(synk): boolean attention mask not wired into the kernel
        #             (and the reference's `energy.mask_fill` is non-mutating).
        return fused_mha(x, self.w_qkv_perm, self.b_qkv_perm,
                         self.w_proj, self.b_proj2d,
                         num_heads=self.num_heads)


# ---------------------------------------------------------------------------
# Pure-JAX reference (mirrors the PyTorch/einops module exactly)
# ---------------------------------------------------------------------------

def reference_forward(mha: MultiHeadAttentionPallas, x):
    b, n, e = x.shape
    h = mha.num_heads
    d = e // h
    qkv = x.reshape(b * n, e) @ mha.w_qkv + mha.b_qkv
    qkv = qkv.reshape(b, n, h, d, 3)
    qkv = jnp.transpose(qkv, (4, 0, 2, 1, 3))          # 'b n (h d qkv) -> qkv b h n d'
    q, k, v = qkv[0], qkv[1], qkv[2]
    energy = jnp.einsum("bhqd,bhkd->bhqk", q, k)
    att = jax.nn.softmax(energy / (e ** 0.5), axis=-1)
    out = jnp.einsum("bhal,bhlv->bhav", att, v)
    out = jnp.transpose(out, (0, 2, 1, 3)).reshape(b, n, e)
    out = out.reshape(b * n, e) @ mha.w_proj + mha.b_proj
    return out.reshape(b, n, e)


if __name__ == "__main__":
    key = jax.random.PRNGKey(0)
    kx, kp = jax.random.split(key)

    batch, seq, emb, heads = 2, 8, 32, 4
    x = jax.random.normal(kx, (batch, seq, emb), dtype=jnp.float32)

    mha = MultiHeadAttentionPallas(emb_size=emb, num_heads=heads, key=kp)

    y = mha(x)
    y = jax.block_until_ready(y)

    y_ref = reference_forward(mha, x)
    assert y.shape == (batch, seq, emb)
    # approx=True reciprocal (EUP vrcp) -> allow a slightly looser tolerance.
    assert jnp.allclose(y, y_ref, atol=2e-3, rtol=2e-3), "mismatch vs reference"

    print("KERNEL_OK")
</pallas_src>

<mosaic_0001>
module attributes {stable_mosaic.version = 11 : i64} {
  func.func @kernel(%arg0: i32, %arg1: memref<1x8x32xf32, #tpu.memory_space<vmem>>, %arg2: memref<32x96xf32, #tpu.memory_space<vmem>>, %arg3: memref<1x96xf32, #tpu.memory_space<vmem>>, %arg4: memref<32x32xf32, #tpu.memory_space<vmem>>, %arg5: memref<1x32xf32, #tpu.memory_space<vmem>>, %arg6: memref<1x8x32xf32, #tpu.memory_space<vmem>>) attributes {dimension_semantics = [#tpu.dimension_semantics<parallel>], iteration_bounds = array<i64: 2>, scalar_prefetch = 0 : i64, scratch_operands = 0 : i64, tpu.core_type = #tpu.core_type<tc>, window_params = [{transform_indices = @transform_0, window_bounds = array<i64: 1, 8, 32>}, {pipeline_mode = #tpu.pipeline_mode<synchronous>, transform_indices = @transform_1, window_bounds = array<i64: 32, 96>}, {pipeline_mode = #tpu.pipeline_mode<synchronous>, transform_indices = @transform_2, window_bounds = array<i64: 1, 96>}, {pipeline_mode = #tpu.pipeline_mode<synchronous>, transform_indices = @transform_3, window_bounds = array<i64: 32, 32>}, {pipeline_mode = #tpu.pipeline_mode<synchronous>, transform_indices = @transform_4, window_bounds = array<i64: 1, 32>}, {transform_indices = @transform_5, window_bounds = array<i64: 1, 8, 32>}]} {
    %c0 = arith.constant 0 : index
    %c0_0 = arith.constant 0 : index
    %c0_1 = arith.constant 0 : index
    %0 = vector.load %arg1[%c0, %c0_0, %c0_1] : memref<1x8x32xf32, #tpu.memory_space<vmem>>, vector<1x8x32xf32>
    %1 = vector.shape_cast %0 : vector<1x8x32xf32> to vector<8x32xf32>
    %c0_2 = arith.constant 0 : index
    %c0_3 = arith.constant 0 : index
    %2 = vector.load %arg2[%c0_2, %c0_3] : memref<32x96xf32, #tpu.memory_space<vmem>>, vector<32x96xf32>
    %cst = arith.constant dense<0.000000e+00> : vector<8x96xf32>
    %3 = tpu.matmul %1, %2, %cst {dimension_numbers = #tpu.dot_dimension_numbers<[1], [0], [0], [1], [0, 0, 1, 1], [], []>} : vector<8x32xf32>, vector<32x96xf32>, vector<8x96xf32> -> vector<8x96xf32>
    %c0_4 = arith.constant 0 : index
    %c0_5 = arith.constant 0 : index
    %4 = vector.load %arg3[%c0_4, %c0_5] : memref<1x96xf32, #tpu.memory_space<vmem>>, vector<1x96xf32>
    %5 = vector.broadcast %4 : vector<1x96xf32> to vector<8x96xf32>
    %6 = arith.addf %3, %5 : vector<8x96xf32>
    %7 = vector.extract_strided_slice %6 {offsets = [0, 0], sizes = [8, 32], strides = [1, 1]} : vector<8x96xf32> to vector<8x32xf32>
    %cst_6 = arith.constant 0.176776692 : f32
    %8 = vector.broadcast %cst_6 : f32 to vector<8x32xf32>
    %9 = arith.mulf %7, %8 : vector<8x32xf32>
    %10 = vector.extract_strided_slice %6 {offsets = [0, 32], sizes = [8, 32], strides = [1, 1]} : vector<8x96xf32> to vector<8x32xf32>
    %11 = vector.extract_strided_slice %6 {offsets = [0, 64], sizes = [8, 32], strides = [1, 1]} : vector<8x96xf32> to vector<8x32xf32>
    %12 = vector.extract_strided_slice %9 {offsets = [0, 0], sizes = [8, 8], strides = [1, 1]} : vector<8x32xf32> to vector<8x8xf32>
    %13 = vector.extract_strided_slice %10 {offsets = [0, 0], sizes = [8, 8], strides = [1, 1]} : vector<8x32xf32> to vector<8x8xf32>
    %14 = vector.extract_strided_slice %11 {offsets = [0, 0], sizes = [8, 8], strides = [1, 1]} : vector<8x32xf32> to vector<8x8xf32>
    %cst_7 = arith.constant dense<0.000000e+00> : vector<8x8xf32>
    %15 = tpu.matmul %12, %13, %cst_7 {dimension_numbers = #tpu.dot_dimension_numbers<[1], [1], [0], [0], [0, 0, 1, 0], [], []>} : vector<8x8xf32>, vector<8x8xf32>, vector<8x8xf32> -> vector<8x8xf32>
    %cst_8 = arith.constant dense<0xFF800000> : vector<8xf32>
    %16 = vector.multi_reduction <maximumf>, %15, %cst_8 [1] : vector<8x8xf32> to vector<8xf32>
    %17 = vector.shape_cast %16 : vector<8xf32> to vector<8x1xf32>
    %18 = vector.broadcast %17 : vector<8x1xf32> to vector<8x8xf32>
    %19 = arith.subf %15, %18 : vector<8x8xf32>
    %20 = math.exp %19 : vector<8x8xf32>
    %cst_9 = arith.constant dense<0.000000e+00> : vector<8xf32>
    %21 = vector.multi_reduction <add>, %20, %cst_9 [1] : vector<8x8xf32> to vector<8xf32>
    %22 = vector.shape_cast %21 : vector<8xf32> to vector<8x1xf32>
    %23 = tpu.reciprocal %22 {approx = true} : vector<8x1xf32> -> vector<8x1xf32>
    %24 = vector.broadcast %23 : vector<8x1xf32> to vector<8x8xf32>
    %25 = arith.mulf %20, %24 : vector<8x8xf32>
    %cst_10 = arith.constant dense<0.000000e+00> : vector<8x8xf32>
    %26 = tpu.matmul %25, %14, %cst_10 {dimension_numbers = #tpu.dot_dimension_numbers<[1], [0], [0], [1], [0, 0, 1, 1], [], []>} : vector<8x8xf32>, vector<8x8xf32>, vector<8x8xf32> -> vector<8x8xf32>
    %27 = vector.extract_strided_slice %9 {offsets = [0, 8], sizes = [8, 8], strides = [1, 1]} : vector<8x32xf32> to vector<8x8xf32>
    %28 = vector.extract_strided_slice %10 {offsets = [0, 8], sizes = [8, 8], strides = [1, 1]} : vector<8x32xf32> to vector<8x8xf32>
    %29 = vector.extract_strided_slice %11 {offsets = [0, 8], sizes = [8, 8], strides = [1, 1]} : vector<8x32xf32> to vector<8x8xf32>
    %cst_11 = arith.constant dense<0.000000e+00> : vector<8x8xf32>
    %30 = tpu.matmul %27, %28, %cst_11 {dimension_numbers = #tpu.dot_dimension_numbers<[1], [1], [0], [0], [0, 0, 1, 0], [], []>} : vector<8x8xf32>, vector<8x8xf32>, vector<8x8xf32> -> vector<8x8xf32>
    %cst_12 = arith.constant dense<0xFF800000> : vector<8xf32>
    %31 = vector.multi_reduction <maximumf>, %30, %cst_12 [1] : vector<8x8xf32> to vector<8xf32>
    %32 = vector.shape_cast %31 : vector<8xf32> to vector<8x1xf32>
    %33 = vector.broadcast %32 : vector<8x1xf32> to vector<8x8xf32>
    %34 = arith.subf %30, %33 : vector<8x8xf32>
    %35 = math.exp %34 : vector<8x8xf32>
    %cst_13 = arith.constant dense<0.000000e+00> : vector<8xf32>
    %36 = vector.multi_reduction <add>, %35, %cst_13 [1] : vector<8x8xf32> to vector<8xf32>
    %37 = vector.shape_cast %36 : vector<8xf32> to vector<8x1xf32>
    %38 = tpu.reciprocal %37 {approx = true} : vector<8x1xf32> -> vector<8x1xf32>
    %39 = vector.broadcast %38 : vector<8x1xf32> to vector<8x8xf32>
    %40 = arith.mulf %35, %39 : vector<8x8xf32>
    %cst_14 = arith.constant dense<0.000000e+00> : vector<8x8xf32>
    %41 = tpu.matmul %40, %29, %cst_14 {dimension_numbers = #tpu.dot_dimension_numbers<[1], [0], [0], [1], [0, 0, 1, 1], [], []>} : vector<8x8xf32>, vector<8x8xf32>, vector<8x8xf32> -> vector<8x8xf32>
    %42 = vector.extract_strided_slice %9 {offsets = [0, 16], sizes = [8, 8], strides = [1, 1]} : vector<8x32xf32> to vector<8x8xf32>
    %43 = vector.extract_strided_slice %10 {offsets = [0, 16], sizes = [8, 8], strides = [1, 1]} : vector<8x32xf32> to vector<8x8xf32>
    %44 = vector.extract_strided_slice %11 {offsets = [0, 16], sizes = [8, 8], strides = [1, 1]} : vector<8x32xf32> to vector<8x8xf32>
    %cst_15 = arith.constant dense<0.000000e+00> : vector<8x8xf32>
    %45 = tpu.matmul %42, %43, %cst_15 {dimension_numbers = #tpu.dot_dimension_numbers<[1], [1], [0], [0], [0, 0, 1, 0], [], []>} : vector<8x8xf32>, vector<8x8xf32>, vector<8x8xf32> -> vector<8x8xf32>
    %cst_16 = arith.constant dense<0xFF800000> : vector<8xf32>
    %46 = vector.multi_reduction <maximumf>, %45, %cst_16 [1] : vector<8x8xf32> to vector<8xf32>
    %47 = vector.shape_cast %46 : vector<8xf32> to vector<8x1xf32>
    %48 = vector.broadcast %47 : vector<8x1xf32> to vector<8x8xf32>
    %49 = arith.subf %45, %48 : vector<8x8xf32>
    %50 = math.exp %49 : vector<8x8xf32>
    %cst_17 = arith.constant dense<0.000000e+00> : vector<8xf32>
    %51 = vector.multi_reduction <add>, %50, %cst_17 [1] : vector<8x8xf32> to vector<8xf32>
    %52 = vector.shape_cast %51 : vector<8xf32> to vector<8x1xf32>
    %53 = tpu.reciprocal %52 {approx = true} : vector<8x1xf32> -> vector<8x1xf32>
    %54 = vector.broadcast %53 : vector<8x1xf32> to vector<8x8xf32>
    %55 = arith.mulf %50, %54 : vector<8x8xf32>
    %cst_18 = arith.constant dense<0.000000e+00> : vector<8x8xf32>
    %56 = tpu.matmul %55, %44, %cst_18 {dimension_numbers = #tpu.dot_dimension_numbers<[1], [0], [0], [1], [0, 0, 1, 1], [], []>} : vector<8x8xf32>, vector<8x8xf32>, vector<8x8xf32> -> vector<8x8xf32>
    %57 = vector.extract_strided_slice %9 {offsets = [0, 24], sizes = [8, 8], strides = [1, 1]} : vector<8x32xf32> to vector<8x8xf32>
    %58 = vector.extract_strided_slice %10 {offsets = [0, 24], sizes = [8, 8], strides = [1, 1]} : vector<8x32xf32> to vector<8x8xf32>
    %59 = vector.extract_strided_slice %11 {offsets = [0, 24], sizes = [8, 8], strides = [1, 1]} : vector<8x32xf32> to vector<8x8xf32>
    %cst_19 = arith.constant dense<0.000000e+00> : vector<8x8xf32>
    %60 = tpu.matmul %57, %58, %cst_19 {dimension_numbers = #tpu.dot_dimension_numbers<[1], [1], [0], [0], [0, 0, 1, 0], [], []>} : vector<8x8xf32>, vector<8x8xf32>, vector<8x8xf32> -> vector<8x8xf32>
    %cst_20 = arith.constant dense<0xFF800000> : vector<8xf32>
    %61 = vector.multi_reduction <maximumf>, %60, %cst_20 [1] : vector<8x8xf32> to vector<8xf32>
    %62 = vector.shape_cast %61 : vector<8xf32> to vector<8x1xf32>
    %63 = vector.broadcast %62 : vector<8x1xf32> to vector<8x8xf32>
    %64 = arith.subf %60, %63 : vector<8x8xf32>
    %65 = math.exp %64 : vector<8x8xf32>
    %cst_21 = arith.constant dense<0.000000e+00> : vector<8xf32>
    %66 = vector.multi_reduction <add>, %65, %cst_21 [1] : vector<8x8xf32> to vector<8xf32>
    %67 = vector.shape_cast %66 : vector<8xf32> to vector<8x1xf32>
    %68 = tpu.reciprocal %67 {approx = true} : vector<8x1xf32> -> vector<8x1xf32>
    %69 = vector.broadcast %68 : vector<8x1xf32> to vector<8x8xf32>
    %70 = arith.mulf %65, %69 : vector<8x8xf32>
    %cst_22 = arith.constant dense<0.000000e+00> : vector<8x8xf32>
    %71 = tpu.matmul %70, %59, %cst_22 {dimension_numbers = #tpu.dot_dimension_numbers<[1], [0], [0], [1], [0, 0, 1, 1], [], []>} : vector<8x8xf32>, vector<8x8xf32>, vector<8x8xf32> -> vector<8x8xf32>
    %72 = tpu.concatenate %26, %41, %56, %71 in 1 : vector<8x8xf32>, vector<8x8xf32>, vector<8x8xf32>, vector<8x8xf32> -> vector<8x32xf32>
    %c0_23 = arith.constant 0 : index
    %c0_24 = arith.constant 0 : index
    %73 = vector.load %arg4[%c0_23, %c0_24] : memref<32x32xf32, #tpu.memory_space<vmem>>, vector<32x32xf32>
    %cst_25 = arith.constant dense<0.000000e+00> : vector<8x32xf32>
    %74 = tpu.matmul %72, %73, %cst_25 {dimension_numbers = #tpu.dot_dimension_numbers<[1], [0], [0], [1], [0, 0, 1, 1], [], []>} : vector<8x32xf32>, vector<32x32xf32>, vector<8x32xf32> -> vector<8x32xf32>
    %c0_26 = arith.constant 0 : index
    %c0_27 = arith.constant 0 : index
    %75 = vector.load %arg5[%c0_26, %c0_27] : memref<1x32xf32, #tpu.memory_space<vmem>>, vector<1x32xf32>
    %76 = vector.broadcast %75 : vector<1x32xf32> to vector<8x32xf32>
    %77 = arith.addf %74, %76 : vector<8x32xf32>
    %c0_28 = arith.constant 0 : index
    %c0_29 = arith.constant 0 : index
    %c0_30 = arith.constant 0 : index
    %78 = vector.load %arg6[%c0_28, %c0_29, %c0_30] : memref<1x8x32xf32, #tpu.memory_space<vmem>>, vector<1x8x32xf32>
    %79 = vector.shape_cast %78 : vector<1x8x32xf32> to vector<8x32xf32>
    %80 = vector.shape_cast %77 : vector<8x32xf32> to vector<1x8x32xf32>
    tpu.vector_store %arg6[%c0_28, %c0_29, %c0_30], %80 {strides = array<i32>} : memref<1x8x32xf32, #tpu.memory_space<vmem>>, vector<1x8x32xf32>,
    return
  }
  func.func @transform_0(%arg0: i32) -> (i32, i32, i32) {
    %c0_i32 = arith.constant 0 : i32
    %c0_i32_0 = arith.constant 0 : i32
    %c0_i32_1 = arith.constant 0 : i32
    return %arg0, %c0_i32, %c0_i32_0 : i32, i32, i32
  }
  func.func @transform_1(%arg0: i32) -> (i32, i32) {
    %c0_i32 = arith.constant 0 : i32
    %c0_i32_0 = arith.constant 0 : i32
    %c0_i32_1 = arith.constant 0 : i32
    return %c0_i32, %c0_i32_0 : i32, i32
  }
  func.func @transform_2(%arg0: i32) -> (i32, i32) {
    %c0_i32 = arith.constant 0 : i32
    %c0_i32_0 = arith.constant 0 : i32
    %c0_i32_1 = arith.constant 0 : i32
    return %c0_i32, %c0_i32_0 : i32, i32
  }
  func.func @transform_3(%arg0: i32) -> (i32, i32) {
    %c0_i32 = arith.constant 0 : i32
    %c0_i32_0 = arith.constant 0 : i32
    %c0_i32_1 = arith.constant 0 : i32
    return %c0_i32, %c0_i32_0 : i32, i32
  }
  func.func @transform_4(%arg0: i32) -> (i32, i32) {
    %c0_i32 = arith.constant 0 : i32
    %c0_i32_0 = arith.constant 0 : i32
    %c0_i32_1 = arith.constant 0 : i32
    return %c0_i32, %c0_i32_0 : i32, i32
  }
  func.func @transform_5(%arg0: i32) -> (i32, i32, i32) {
    %c0_i32 = arith.constant 0 : i32
    %c0_i32_0 = arith.constant 0 : i32
    %c0_i32_1 = arith.constant 0 : i32
    return %arg0, %c0_i32, %c0_i32_0 : i32, i32, i32
  }
}

</mosaic_0001>

<bundles_post_ra>
// kernel: tpu_custom_call.1
= control target key start
LH: loop header
LB: loop body
LE: loop exit
PB: predicated region body
PF: predicated region fallthrough
CT: control target
= control target key end

     0   :  { %10 = vsyncpa [#allocation3], 0  ;;  %s1255_s0 = inlined_call_operand.hbm [shape: f32[2,8,32], index: 0, kind: input, shape index: {}]   ;;  %s1256_s1 = inlined_call_operand.hbm [shape: f32[32,96], index: 1, kind: input, shape index: {}]   ;;  %s1257_s2 = inlined_call_operand.vmem [shape: f32[1,96], index: 2, kind: input, shape index: {}]   ;;  %s1258_s3 = inlined_call_operand.hbm [shape: f32[32,32], index: 3, kind: input, shape index: {}]   ;;  %s1259_s4 = inlined_call_operand.vmem [shape: f32[1,32], index: 4, kind: input, shape index: {}]   ;;  %s1260_s5 = inlined_call_operand.hbm [shape: f32[2,8,32], index: 5, kind: output, shape index: {}]  }
   0x1   :  { %12 = vsyncpa [#allocation3 + $0x1], 0 }
   0x2   :  { %13 = vsyncpa [#allocation6], 0 }
   0x3   :  { %14 = vsyncpa [#allocation4], 0 }
   0x4   :  { %16 = vsyncpa [#allocation4 + $0x1], 0  ;;  %s1065_s18 = smov 0   ;;  %s1067_s19 = smov 0  }
   0x5   :  { %s1069_s20 = smov 0   ;;  %s1071_s21 = smov 0  }
   0x6 LB: > { %s174_s24 = sshll.u32 %s1256_s1, 4  ;;  %s1089_s25 = sadd.s32 4294967295, %s1015_s21   ;;  %s1015_s21 = sphi %s1071_s21, %s1271_s21   ;;  %s1011_s20 = sphi %s1069_s20, %s1270_s20   ;;  %s1007_s19 = sphi %s1067_s19, %s1269_s19   ;;  %s1003_s18 = sphi %s1065_s18, %s1268_s18   ;;  %s175_s24 = int_to_ptr.hbm [resolvable:$true] %s174_s24 }
   0x7   : > { %p725_p0 = scmp.ge.s32.totalorder %s1015_s21, 1  ;;  %p43_p1 = scmp.eq.s32.totalorder %s1089_s25, 0 }
   0x8   : > { %p163_p2 = scmp.lt.s32.totalorder %s1015_s21, 3  ;;  %s1017_s27 = smov [#allocation5]  }
   0x9   : > { %s176_s28 = sshll.u32 %s1017_s27, 4  ;;  %s191_s6 = sshll.u32 %s1258_s3, 4  ;;  %s177_s28 = int_to_ptr.vmem [resolvable:$true] %s176_s28  ;;  %s192_s6 = int_to_ptr.hbm [resolvable:$true] %s191_s6 }
   0xa   : > { %p1094_p3 = pnand %p725_p0, %p163_p2  ;;  %s1018_s7 = smov [#allocation7]  }
   0xb   : > { %s193_s8 = sshll.u32 %s1018_s7, 4  ;;  %s1019_s9 = smov 128   ;;  %s194_s8 = int_to_ptr.vmem [resolvable:$true] %s193_s8 }
   0xc   : > { %p766_p4 = pneg %p1094_p3  ;;  %s1020_s10 = smov 8  }
   0xd   : > { %s724_s11 = sadd.s32 4294967294, %s1015_s21   ;;  %s1108_s12 = sadd.s32 1, %s1015_s21  }
   0xe   : > { %p767_p6 = pnand %p766_p4, %p43_p1  ;;  %s26_s13 = ssub.s32 %s1015_s21, %s1108_s12 }
   0xf   : > { %s29_s14 = sadd.s32 1, %s1011_s20  ;;  %p27_p7 = scmp.eq.s32.totalorder %s26_s13, 0 }
  0x10   : > { %769 = dma.hbm_to_vmem [thread:$0]  (!%p767_p6), %s175_s24, 512, %s177_s28, [#allocation6], %s1019_s9, %s1019_s9, %s1020_s10  }
  0x11   : > { %772 = dma.hbm_to_vmem [thread:$0]  (!%p767_p6), %s192_s6, 512, %s194_s8, [#allocation6], %s1019_s9, %s1019_s9, %s1020_s10  }
  0x12   : > { %p36_p8 = scmp.ne.s32.totalorder %s1011_s20, %s1007_s19  ;;  %p37_p9 = scmp.eq.s32.totalorder %s1015_s21, 0 }
  0x13   : > { %p42_p10 = scmp.ne.s32.totalorder %s1007_s19, %s1003_s18  ;;  %p150_p13 = scmp.eq.s32.totalorder %s1089_s25, 1 }
  0x14   : > { %s1119_s15 = scalar_select %p27_p7, %s1011_s20, %s29_s14  }
  0x15   : > { %p1121_p11 = por %p37_p9, %p36_p8  ;;  %p1127_p12 = por %p43_p1, %p42_p10 }
  0x16   : > { %p156_p0 = scmp.eq.s32.totalorder %s724_s11, 1  ;;  %p783_p2 = scmp.lt.s32.totalorder %s1015_s21, 2 }
  0x17   : > { %s210_s22 = sand.u32 1, %s1011_s20   ;;  %p1134_p4 = por %p150_p13, %p36_p8 }
  0x18   : > { %p1138_p6 = por %p156_p0, %p42_p10  ;;  %s729_s27 = sshll.u32 %s210_s22, 3 }
  0x19   : > { %s730_s28 = sshll.u32 %s1015_s21, 3  ;;  %s214_s7 = scalar_lea.vmem [#allocation2], %s729_s27 }
  0x1a   : > { %s218_s6 = scalar_lea.hbm %s1255_s0, %s730_s28  ;;  %s222_s8 = sshll.u32 %s214_s7, 4  ;;  %s223_s8 = int_to_ptr.vmem [resolvable:$true] %s222_s8 }
  0x1b   : > { %s220_s9 = sshll.u32 %s218_s6, 4  ;;  %p1148_p7 = pnand %p783_p2, %p1121_p11  ;;  %s221_s9 = int_to_ptr.hbm [resolvable:$true] %s220_s9 }
  0x1c   : > { %s211_s11 = scalar_lea.sflag [#allocation3], %s210_s22  ;;  %s915_s13 = sshra.s32 %s221_s9, 4  ;;  %s916_s13 = int_to_ptr.hbm [resolvable:$true] %s915_s13 }
  0x1d   : > { %s917_s14 = scalar_lea.hbm %s916_s13, 8  ;;  %p919_p9 = pneg %p1148_p7 }
  0x1e   : > { %p918_p8 = scmp.ne.s32.totalorder %s916_s13, %s917_s14  ;;  %s922_s29 = scalar_lea.hbm %s1255_s0, 16 }
  0x1f   : > { %p923_p11 = scmp.lt.s32.totalorder %s916_s13, %s1255_s0  ;;  %p924_p0 = scmp.lt.s32.totalorder %s922_s29, %s917_s14 }
  0x20   : > { %p920_p10 = pnand %p919_p9, %p918_p8 }
  0x21   : > { %p925_p2 = por %p924_p0, %p923_p11 }
  0x22   : > { %p921_p13 = pneg %p920_p10 }
  0x24   : > { %p926_p5 = pnand %p925_p2, %p921_p13 }
  0x26   : > { %929 = shalt.err (!%p926_p5)
}
  0x27   : > { %776 = dma.hbm_to_vmem [thread:$0]  (!%p1148_p7), %s221_s9, 128, %s223_s8, %s211_s11  }
  0x28   : > { %231 = sbr.rel (%p1094_p3) target bundleno = 1099 (0x44b), region = 40  ;;  %s1165_s22 = sand.u32 (!%p1094_p3), 1, %s1007_s19  }
  0x29   : > { %s732_s6 = sshll.u32 (!%p1094_p3), %s1165_s22, 3  ;;  %s234_s7 = scalar_lea.sflag (!%p1094_p3), [#allocation3], %s1165_s22 }
  0x2a   : > { %s237_s13 = scalar_lea.vmem (!%p1094_p3), [#allocation2], %s732_s6 }
  0x2d   : > { %990 = dma.done.wait (%p1127_p12), %s234_s7, 128  }
  0x2e   : > { %992 = vsyncadd (%p1127_p12), %s234_s7, 4294967168 }
  0x2f   : > { %994 = dma.done.wait (%p43_p1), [#allocation6], 1024  }
  0x30   : > { %996 = vsyncadd (%p43_p1), [#allocation6], 4294966272  ;;  %v279_v0 = vld [vmem:[#allocation5 + $0x18] sm:$0xff]  ;;  %v278_v1 = vld [vmem:[#allocation5 + $0x10] sm:$0xff]  ;;  %vm284_vm0 = vcmask 261120   ;;  %s1021_s8 = smov 72  }
  0x31   : > { %300 = vmatpush.msra.mxu0 %v279_v0  ;;  %v277_v2 = vld [vmem:[#allocation5 + $0x8] sm:$0xff]  ;;  %v276_v3 = vld [vmem:[#allocation5] sm:$0xff]  ;;  %v275_v4 = vld [vmem:[%s237_s13] sm:$0xff]  ;;  %s1022_s9 = smov 96   ;;  %s1023_s10 = smov 120   ;;  %vm312_vm1 = vcmask 64512  }
  0x32   : > { %v837_v5 = vld [vmem:[%s1257_s2] ss:$0 sm:$0xff]  ;;  %s1024_s11 = smov 88   ;;  %s1025_s14 = smov 112   ;;  %v590_v0 = vld [vmem:[#allocation7 + $0x18] sm:$0xff]  ;;  %vm583_vm2 = vcmask 130048  }
  0x33   : > { %301 = vmatpush.msra.mxu0 %v278_v1  ;;  %s1026_s27 = smov 80   ;;  %s1027_s28 = smov 104   ;;  %v589_v1 = vld [vmem:[#allocation7 + $0x10] sm:$0xff]  ;;  %vm585_vm3 = vcmask 195584  }
  0x34   : > { %s1028_s29 = smov 64   ;;  %s1029_s30 = smov 40  }
  0x35   : > { %302 = vmatpush.msra.mxu0 %v277_v2  ;;  %s1030_s16 = smov 56   ;;  %s1031_s7 = smov 48   ;;  %v588_v2 = vld [vmem:[#allocation7 + $0x8] sm:$0xff] }
  0x36   : > { %s1032_s13 = smov 16   ;;  %s1033_s26 = smov 8  }
  0x37   : > { %303 = vmatpush.msra.mxu0 %v276_v3  ;;  %s1034_s17 = smov 24   ;;  %v587_v3 = vld [vmem:[#allocation7] sm:$0xff] }
  0x38   : > { %736 = vmatmul.msk.f32.vlgmr.msra.gmra.mxu0 %vm284_vm0, %v275_v4 }
  0xb5   : > { %v305_v6 = vpop.f32.mrf.mxu0 }
  0xb6   : > { %v1183_v7 = vadd.f32 %v837_v5, %v305_v6 }
  0xb8   : > { %507 = vrot.lane.b32.xlu2 %v1183_v7, %s1021_s8  ;;  %310 = vrot.lane.b32.xlu0 %v1183_v7, %s1022_s9  ;;  %v308_v8 = vmul.f32 0.17677669, %v1183_v7  ;;  %s751_s8 = sshll.u32 %s1089_s25, 3  ;;  %s620_s25 = scalar_lea.sflag [#allocation4], %s1165_s22 }
  0xba   : > { %375 = vrot.lane.b32.xlu1 %v308_v8, %s1023_s10 }
  0xc0   : > { %377 = vrot.lane.b32.xlu0 %v1183_v7, %s1024_s11  ;;  %440 = vrot.lane.b32.xlu2 %v308_v8, %s1025_s14  ;;  %s630_s11 = scalar_lea.hbm %s1260_s5, %s751_s8 }
  0xc2   : > { %442 = vrot.lane.b32.xlu1 %v1183_v7, %s1026_s27 }
  0xc8   : > { %505 = vrot.lane.b32.xlu0 %v308_v8, %s1027_s28  ;;  %s274_s28 = scalar_lea.vmem [#allocation8], %s732_s6  ;;  %s965_s6 = scalar_lea.hbm %s1260_s5, 16 }
 0x112   : > { %v508_v9 = vpop.permute.xlu2 %507 }
 0x113   : > { %746 = vmatpush.xpose.msk.msrb.mxu0 %vm312_vm1, %v508_v9 }
 0x11a   : > { %v441_v14 = vpop.permute.xlu2 %440 }
 0x12a   : > { %v311_v10 = vpop.permute.xlu0 %310 }
 0x12b   : > { %737 = vmatpush.xpose.msk.msra.mxu1 %vm312_vm1, %v311_v10  ;;  %v838_v10 = vld [vmem:[%s1259_s4] ss:$0 sm:$0xff] }
 0x12c   : > { %v376_v11 = vpop.permute.xlu1 %375 }
 0x12e   : > { %738 = vmatmul.msk.f32.vlgmr.msra.gmra.mxu1 %vm312_vm1, %v308_v8 }
 0x132   : > { %v378_v12 = vpop.permute.xlu0 %377 }
 0x133   : > { %740 = vmatpush.xpose.msk.msra.mxu3 %vm312_vm1, %v378_v12 }
 0x134   : > { %v443_v13 = vpop.permute.xlu1 %442 }
 0x135   : > { %743 = vmatpush.xpose.msk.msrb.mxu1 %vm312_vm1, %v443_v13 }
 0x136   : > { %741 = vmatmul.msk.f32.vlgmr.msra.gmra.mxu3 %vm312_vm1, %v376_v11 }
 0x138   : > { %744 = vmatmul.msk.f32.vlgmr.msrb.gmra.mxu1 %vm312_vm1, %v441_v14 }
 0x139   : > { %610 = vmatpush.msra.mxu1 %v590_v0 }
 0x13a   : > { %v506_v15 = vpop.permute.xlu0 %505 }
 0x13b   : > { %747 = vmatmul.msk.f32.vlgmr.msrb.gmra.mxu0 %vm312_vm1, %v506_v15  ;;  %611 = vmatpush.msra.mxu1 %v589_v1 }
 0x13d   : > { %612 = vmatpush.msra.mxu1 %v588_v2 }
 0x13f   : > { %613 = vmatpush.msra.mxu1 %v587_v3 }
 0x1ab   : > { %v335_v16 = vpop.f32.mrf.mxu1 }
 0x1ac   : > { %v338_v17 = vsel %vm312_vm1, %v335_v16, -inf }
 0x1ad   : > { %339 = vmax.xlane.f32.xlu1 %v338_v17 }
 0x1b5   : > { %v465_v18 = vpop.f32.mrf.mxu1 }
 0x1b6   : > { %v468_v19 = vsel %vm312_vm1, %v465_v18, -inf }
 0x1b7   : > { %469 = vmax.xlane.f32.xlu0 %v468_v19 }
 0x1b8   : > { %v530_v22 = vpop.f32.mrf.mxu0 }
 0x1b9   : > { %v400_v20 = vpop.f32.mrf.mxu3  ;;  %v533_v23 = vsel %vm312_vm1, %v530_v22, -inf }
 0x1ba   : > { %v403_v21 = vsel %vm312_vm1, %v400_v20, -inf }
 0x1bb   : > { %404 = vmax.xlane.f32.xlu2 %v403_v21 }
 0x1c3   : > { %534 = vmax.xlane.f32.xlu2 %v533_v23 }
 0x1cb   : > { %349 = vrot.lane.b32.xlu0 %v1183_v7, %s1028_s29  ;;  %s632_s29 = sshll.u32 %s274_s28, 4  ;;  %s633_s29 = int_to_ptr.vmem [resolvable:$true] %s632_s29 }
 0x1d3   : > { %544 = vrot.lane.b32.xlu0 %v1183_v7, %s1029_s30  ;;  %s634_s30 = sshll.u32 %s630_s11, 4  ;;  %s635_s30 = int_to_ptr.hbm [resolvable:$true] %s634_s30 }
 0x220   : > { %v340_v24 = vpop.xlane.xlu1 %339 }
 0x221   : > { %v341_v25 = vsub.f32 %v335_v16, %v340_v24 }
 0x223   : > { %v342_v26 = vmul.f32 1.442695, %v341_v25 }
 0x225   : > { %839 = vpow2.f32 %v342_v26 }
 0x22a   : > { %v470_v27 = vpop.xlane.xlu0 %469 }
 0x22b   : > { %v840_v28 = vpop.eup %839  ;;  %v471_v29 = vsub.f32 %v465_v18, %v470_v27 }
 0x22c   : > { %v344_v30 = vsel %vm312_vm1, %v840_v28, 0.0 }
 0x22d   : > { %v472_v31 = vmul.f32 1.442695, %v471_v29  ;;  %345 = vadd.xlane.f32.xlu1 %v344_v30 }
 0x22e   : > { %v405_v32 = vpop.xlane.xlu2 %404 }
 0x22f   : > { %841 = vpow2.f32 %v472_v31  ;;  %v406_v37 = vsub.f32 %v400_v20, %v405_v32 }
 0x231   : > { %v407_v39 = vmul.f32 1.442695, %v406_v37 }
 0x235   : > { %v842_v33 = vpop.eup %841 }
 0x236   : > { %v535_v34 = vpop.xlane.xlu2 %534  ;;  %v474_v35 = vsel %vm312_vm1, %v842_v33, 0.0 }
 0x237   : > { %v536_v36 = vsub.f32 %v530_v22, %v535_v34  ;;  %475 = vadd.xlane.f32.xlu1 %v474_v35 }
 0x239   : > { %v537_v38 = vmul.f32 1.442695, %v536_v36 }
 0x23b   : > { %843 = vpow2.f32 %v537_v38 }
 0x23c   : > { %845 = vpow2.f32 %v407_v39 }
 0x23d   : > { %v350_v40 = vpop.permute.xlu0 %349 }
 0x23e   : > { %370 = vmatpush.msra.mxu2 %v350_v40 }
 0x241   : > { %v844_v41 = vpop.eup %843 }
 0x242   : > { %v539_v42 = vsel %vm312_vm1, %v844_v41, 0.0  ;;  %v846_v43 = vpop.eup %845 }
 0x243   : > { %540 = vadd.xlane.f32.xlu2 %v539_v42  ;;  %v409_v44 = vsel %vm312_vm1, %v846_v43, 0.0 }
 0x245   : > { %v545_v53 = vpop.permute.xlu0 %544 }
 0x24b   : > { %410 = vadd.xlane.f32.xlu2 %v409_v44 }
 0x250   : > { %414 = vrot.lane.b32.xlu1 %v1183_v7, %s1030_s16  ;;  %s959_s16 = sshra.s32 %s635_s30, 4  ;;  %s960_s16 = int_to_ptr.hbm [resolvable:$true] %s959_s16 }
 0x251   : > { %p966_p12 = scmp.lt.s32.totalorder %s960_s16, %s1260_s5 }
 0x263   : > { %479 = vrot.lane.b32.xlu2 %v1183_v7, %s1031_s7  ;;  %s961_s7 = scalar_lea.hbm %s960_s16, 8 }
 0x264   : > { %p962_p1 = scmp.ne.s32.totalorder %s960_s16, %s961_s7  ;;  %p967_p7 = scmp.lt.s32.totalorder %s965_s6, %s961_s7 }
 0x266   : > { %p963_p3 = pnand %p962_p1, %p1134_p4  ;;  %p968_p8 = por %p967_p7, %p966_p12 }
 0x268   : > { %p964_p5 = pneg %p963_p3 }
 0x26a   : > { %p969_p9 = pnand %p968_p8, %p964_p5 }
 0x2a0   : > { %v346_v45 = vpop.xlane.xlu1 %345 }
 0x2a1   : > { %847 = vrcp.f32 %v346_v45 }
 0x2a7   : > { %v848_v46 = vpop.eup %847 }
 0x2a8   : > { %v348_v47 = vmul.f32 %v848_v46, %v840_v28 }
 0x2aa   : > { %739 = vmatmul.msk.f32.vlgmr.msra.gmra.mxu2 %vm312_vm1, %v348_v47  ;;  %v476_v49 = vpop.xlane.xlu1 %475 }
 0x2ab   : > { %849 = vrcp.f32 %v476_v49 }
 0x2b1   : > { %v850_v52 = vpop.eup %849 }
 0x2b2   : > { %v478_v57 = vmul.f32 %v850_v52, %v842_v33 }
 0x2b6   : > { %v541_v48 = vpop.xlane.xlu2 %540 }
 0x2be   : > { %v411_v50 = vpop.xlane.xlu2 %410 }
 0x2bf   : > { %851 = vrcp.f32 %v411_v50 }
 0x2c0   : > { %853 = vrcp.f32 %v541_v48 }
 0x2c2   : > { %v415_v51 = vpop.permute.xlu1 %414 }
 0x2c3   : > { %435 = vmatpush.msrb.mxu2 %v415_v51 }
 0x2c5   : > { %565 = vmatpush.msra.mxu2 %v545_v53  ;;  %v852_v54 = vpop.eup %851 }
 0x2c6   : > { %v480_v55 = vpop.permute.xlu2 %479  ;;  %v413_v56 = vmul.f32 %v852_v54, %v846_v43  ;;  %v854_v58 = vpop.eup %853 }
 0x2c7   : > { %500 = vmatpush.msrb.mxu3 %v480_v55  ;;  %v543_v59 = vmul.f32 %v854_v58, %v844_v41 }
 0x2c8   : > { %742 = vmatmul.msk.f32.vlgmr.msrb.gmra.mxu2 %vm312_vm1, %v413_v56  ;;  %745 = vmatmul.msk.f32.vlgmr.msrb.gmra.mxu3 %vm312_vm1, %v478_v57 }
 0x2d0   : > { %748 = vmatmul.msk.f32.vlgmr.msra.gmra.mxu2 %vm312_vm1, %v543_v59 }
 0x32d   : > { %v372_v60 = vpop.f32.mrf.mxu2 }
 0x34b   : > { %v437_v61 = vpop.f32.mrf.mxu2  ;;  %v502_v62 = vpop.f32.mrf.mxu3 }
 0x34c   : > { %575 = vrot.lane.b32.xlu1 %v502_v62, %s1032_s13  ;;  %571 = vrot.lane.b32.xlu0 %v437_v61, %s1033_s26 }
 0x353   : > { %v567_v63 = vpop.f32.mrf.mxu2 }
 0x354   : > { %579 = vrot.lane.b32.xlu0 %v567_v63, %s1034_s17 }
 0x3be   : > { %v572_v4 = vpop.permute.xlu0 %571  ;;  %v576_v6 = vpop.permute.xlu1 %575 }
 0x3bf   : > { %v582_v5 = vsel %vm312_vm1, %v372_v60, %v572_v4 }
 0x3c0   : > { %v584_v7 = vsel %vm583_vm2, %v582_v5, %v576_v6 }
 0x3c6   : > { %v580_v8 = vpop.permute.xlu0 %579 }
 0x3c7   : > { %v586_v9 = vsel %vm585_vm3, %v584_v7, %v580_v8 }
 0x3c8   : > { %749 = vmatmul.msk.f32.vlgmr.msra.gmra.mxu1 %vm284_vm0, %v586_v9 }
 0x445   : > { %v615_v11 = vpop.f32.mrf.mxu1 }
 0x446   : > { %v616_v12 = vadd.f32 %v838_v10, %v615_v11 }
 0x448   : > { %618 = vst.msk [vmem:[%s274_s28] sm:$0xff] %vm284_vm0, %v616_v12 }
 0x449   : > { %972 = shalt.err (!%p969_p9)
}
 0x44a   : > { %764 = dma.vmem_to_hbm [thread:$0]  (%p1134_p4), %s633_s29, 128, %s635_s30, %s620_s25  }
 0x44b PF: > { %s646_s22 = sand.u32 1, %s1003_s18   ;;  %p1267_p10 = scmp.ge.s32.totalorder %s1015_s21, 2 }
 0x44c   : > { %s647_s9 = scalar_lea.sflag [#allocation4], %s646_s22 }
 0x44d   : > { %p778_p13 = pnand %p1267_p10, %p1138_p6 }
 0x44f   : > { %p779_p11 = pneg %p778_p13 }
 0x451   : > { %998 = dma.done.wait (%p779_p11), %s647_s9, 128  }
 0x452   : > { %1000 = vsyncadd (%p779_p11), %s647_s9, 4294967168  ;;  %p19_p0 = scmp.ge.s32.totalorder %s1108_s12, 4   ;;  %s1268_s18 = smov %s1007_s19 }
 0x453   : > { %s1269_s19 = smov %s1011_s20  ;;  %s1270_s20 = smov %s1119_s15 }
 0x454   : > { %s1271_s21 = smov %s1108_s12  ;;  %21 = sbr.rel (!%p19_p0) target bundleno = 6 (0x6), region = 93 }
 0x459   :  { %653 = vsyncpa [#allocation3], 1 }
 0x45a   :  { %655 = vsyncpa [#allocation3 + $0x1], 1 }
 0x45b   :  { %656 = vsyncpa [#allocation6], 1 }
 0x45c   :  { %657 = vsyncpa [#allocation4], 1 }
 0x45d   :  { %659 = vsyncpa [#allocation4 + $0x1], 1 }

</bundles_post_ra>
